<compile_context>
chip_gen: v7x
topology: tpu7x:2x2x1
jax: 0.10.0
libtpu: 0.0.40
codegen_flags: <defaults>
</compile_context>

<pallas_src>
import math

import jax
import jax.numpy as jnp
from jax.experimental import pallas as pl
from jax.experimental.pallas import tpu as pltpu


def _round_up(x, m):
    return ((x + m - 1) // m) * m


def _cdiv(a, b):
    return (a + b - 1) // b


# ----------------------------- Pallas kernel --------------------------------

def _recommender_kernel(
    us_ref,        # (TB, 2E)  bf16  gathered [user | show] embeddings
    tv_ref,        # (TB, 4)   bf16  tv features
    genre_ref,     # (TB, G)   bf16  genre features
    w_tv_ref,      # (4, E/2)  bf16
    w_genre_ref,   # (G, E/2)  bf16
    w1_ref,        # (3E, H)   bf16  rows: user | show | tv_emb | genre_emb
    w2_ref,        # (H, H/2)  bf16
    misc_ref,      # (6, W)    f32   rows: b_tv | b_genre | b1 | b2 | w3 | b3
    out_ref,       # (1, TB)   f32   lane-dense logits
):
    f32 = jnp.float32
    bf16 = jnp.bfloat16
    E2 = us_ref.shape[1]          # 2 * embedding_dim
    Eh = w_tv_ref.shape[1]        # embedding_dim // 2
    H = w1_ref.shape[1]
    Hh = w2_ref.shape[1]

    # Packed biases / fc3 row (static, tile-aligned slices), all f32.
    b_tv = misc_ref[0:1, 0:Eh]        # (1, E/2)
    b_genre = misc_ref[1:2, 0:Eh]     # (1, E/2)
    b1 = misc_ref[2:3, 0:H]           # (1, H)
    b2 = misc_ref[3:4, 0:Hh]          # (1, H/2)
    w3_row = misc_ref[4:5, 0:Hh]      # (1, H/2)
    b3 = misc_ref[5:6, 0:1]           # (1, 1)

    # Content projections (bf16 MXU operands, f32 accumulate + epilogue).
    tv_emb = jnp.maximum(
        jnp.dot(tv_ref[...], w_tv_ref[...], preferred_element_type=f32) + b_tv,
        0.0)                                                       # (TB, E/2)
    genre_emb = jnp.maximum(
        jnp.dot(genre_ref[...], w_genre_ref[...],
                preferred_element_type=f32) + b_genre,
        0.0)                                                       # (TB, E/2)

    # fc1 as summed partial matmuls against row-blocks of the resident w1:
    #   one K=2E matmul for [user|show] + two small K=E/2 matmuls for content.
    h1 = (
        jnp.dot(us_ref[...], w1_ref[0:E2, :], preferred_element_type=f32)
        + jnp.dot(tv_emb.astype(bf16), w1_ref[E2:E2 + Eh, :],
                  preferred_element_type=f32)
        + jnp.dot(genre_emb.astype(bf16), w1_ref[E2 + Eh:E2 + 2 * Eh, :],
                  preferred_element_type=f32)
        + b1)
    h1 = jnp.maximum(h1, 0.0)

    # fc2 + relu  (dropout is identity at inference)
    h2 = jnp.maximum(
        jnp.dot(h1.astype(bf16), w2_ref[...], preferred_element_type=f32) + b2,
        0.0)                                                       # (TB, H/2) f32

    # fc3: contract the hidden axis so the logit row comes out lane-major
    # (1, TB) — lane-dense stores, no (TB, 1) relayout / masked vst.
    logit = jax.lax.dot_general(
        w3_row, h2,
        dimension_numbers=(((1,), (1,)), ((), ())),
        preferred_element_type=f32) + b3                           # (1, TB)

    out_ref[...] = jax.nn.sigmoid(logit) * 5.0


# ------------------------------- wrapper -------------------------------------

_MAX_TILE = 2048
_SMALL_BATCH = 256


def _choose_tiling(batch):
    """Pick (tile_b, num_tiles): single step for small batches, otherwise an
    even number of tiles (>=2, so both v7x TensorCores get work) sized to
    avoid gross padding waste."""
    if batch <= _SMALL_BATCH:
        return _round_up(max(batch, 8), 8), 1
    num_tiles = max(2, _cdiv(batch, _MAX_TILE))
    num_tiles = _round_up(num_tiles, 2)
    tile_b = _round_up(_cdiv(batch, num_tiles), 16)
    return tile_b, num_tiles


def tv_recommender_forward(packed, user_ids, show_ids, tv_features, genre_features):
    """Forward pass. Embedding gathers stay as XLA glue (fused into one
    contiguous (B, 2E) bf16 buffer); projections / MLP run inside one Pallas
    kernel with VMEM-resident bf16 weights."""
    bf16 = jnp.bfloat16

    user_emb = packed["user_embedding"][user_ids]        # (B, E) bf16
    show_emb = packed["show_embedding"][show_ids]        # (B, E) bf16
    us = jnp.concatenate([user_emb, show_emb], axis=1)   # (B, 2E) bf16, K=128 for fc1
    tv = tv_features.astype(bf16)                        # (B, 4)
    genre = genre_features.astype(bf16)                  # (B, G)

    B, E2 = us.shape
    Ctv = tv.shape[1]
    G = genre.shape[1]
    Eh = packed["w_tv"].shape[1]
    K1, H = packed["w1"].shape
    Hh = packed["w2"].shape[1]
    misc_r, misc_w = packed["misc"].shape

    tile_b, num_tiles = _choose_tiling(B)
    Bp = tile_b * num_tiles
    if Bp != B:
        pad = ((0, Bp - B), (0, 0))
        us = jnp.pad(us, pad)
        tv = jnp.pad(tv, pad)
        genre = jnp.pad(genre, pad)

    def act_spec(c):
        return pl.BlockSpec((tile_b, c), lambda i: (i, 0))

    def resident_spec(r, c):
        return pl.BlockSpec((r, c), lambda i: (0, 0))

    out = pl.pallas_call(
        _recommender_kernel,
        out_shape=jax.ShapeDtypeStruct((num_tiles, tile_b), jnp.float32),
        grid=(num_tiles,),
        in_specs=[
            act_spec(E2),                       # [user|show] embeddings
            act_spec(Ctv),                      # tv features
            act_spec(G),                        # genre features
            resident_spec(Ctv, Eh),             # w_tv
            resident_spec(G, Eh),               # w_genre
            resident_spec(K1, H),               # w1
            resident_spec(H, Hh),               # w2
            resident_spec(misc_r, misc_w),      # packed biases + w3 row
        ],
        out_specs=pl.BlockSpec((1, tile_b), lambda i: (i, 0)),
        compiler_params=pltpu.CompilerParams(
            dimension_semantics=("parallel",)),
    )(us, tv, genre,
      packed["w_tv"], packed["w_genre"], packed["w1"], packed["w2"],
      packed["misc"])

    # torch `x.squeeze()` on (B, 1) -> (B,)
    return out.reshape(-1)[:B]


# --------------------------- parameter init / packing ------------------------

def _xavier_uniform(key, shape):
    # weights stored as (fan_in, fan_out) for x @ W
    fan_in, fan_out = shape[0], shape[1]
    limit = math.sqrt(6.0 / (fan_in + fan_out))
    return jax.random.uniform(key, shape, jnp.float32, -limit, limit)


def init_params(key, num_users, num_shows, num_genres, embedding_dim, hidden_dim):
    keys = jax.random.split(key, 7)
    E, H, G = embedding_dim, hidden_dim, num_genres
    input_dim = embedding_dim * 2 + embedding_dim  # 3E
    return {
        "user_embedding": _xavier_uniform(keys[0], (num_users, E)),
        "show_embedding": _xavier_uniform(keys[1], (num_shows, E)),
        "w_tv": _xavier_uniform(keys[2], (4, E // 2)),
        "b_tv": jnp.zeros((1, E // 2), jnp.float32),
        "w_genre": _xavier_uniform(keys[3], (G, E // 2)),
        "b_genre": jnp.zeros((1, E // 2), jnp.float32),
        "w1": _xavier_uniform(keys[4], (input_dim, H)),
        "b1": jnp.zeros((1, H), jnp.float32),
        "w2": _xavier_uniform(keys[5], (H, H // 2)),
        "b2": jnp.zeros((1, H // 2), jnp.float32),
        "w3": _xavier_uniform(keys[6], (H // 2, 1)),
        "b3": jnp.zeros((1, 1), jnp.float32),
    }


def pack_params(params):
    """Build kernel-ready packed parameters ONCE: bf16 MXU weights + a single
    f32 pack holding every bias and the fc3 weight row."""
    E = params["user_embedding"].shape[1]
    H = params["w1"].shape[1]
    Eh = E // 2
    Hh = H // 2
    W = max(Eh, H, Hh, 1)
    bf16 = jnp.bfloat16

    misc = jnp.zeros((6, W), jnp.float32)
    misc = misc.at[0, 0:Eh].set(params["b_tv"][0])
    misc = misc.at[1, 0:Eh].set(params["b_genre"][0])
    misc = misc.at[2, 0:H].set(params["b1"][0])
    misc = misc.at[3, 0:Hh].set(params["b2"][0])
    misc = misc.at[4, 0:Hh].set(params["w3"][:, 0])
    misc = misc.at[5, 0].set(params["b3"][0, 0])

    return {
        "user_embedding": params["user_embedding"].astype(bf16),
        "show_embedding": params["show_embedding"].astype(bf16),
        "w_tv": params["w_tv"].astype(bf16),
        "w_genre": params["w_genre"].astype(bf16),
        "w1": params["w1"].astype(bf16),
        "w2": params["w2"].astype(bf16),
        "misc": misc,
    }


# ------------------------------- demo ----------------------------------------

if __name__ == "__main__":
    NUM_USERS = 100
    NUM_SHOWS = 50
    NUM_GENRES = 20
    EMBEDDING_DIM = 64
    HIDDEN_DIM = 128
    BATCH = 8

    root = jax.random.PRNGKey(0)
    k_params, k_u, k_s, k_tv, k_g = jax.random.split(root, 5)

    raw_params = init_params(
        k_params, NUM_USERS, NUM_SHOWS, NUM_GENRES, EMBEDDING_DIM, HIDDEN_DIM
    )
    packed = pack_params(raw_params)   # built once, reused every call

    user_ids = jax.random.randint(k_u, (BATCH,), 0, NUM_USERS, dtype=jnp.int32)
    show_ids = jax.random.randint(k_s, (BATCH,), 0, NUM_SHOWS, dtype=jnp.int32)
    tv_features = jax.random.uniform(k_tv, (BATCH, 4), jnp.float32)
    genre_features = (
        jax.random.uniform(k_g, (BATCH, NUM_GENRES), jnp.float32) > 0.7
    ).astype(jnp.float32)

    forward = jax.jit(tv_recommender_forward)
    preds = forward(packed, user_ids, show_ids, tv_features, genre_features)
    preds = jax.block_until_ready(preds)

    # sanity: shape (BATCH,), values in (0, 5), finite
    assert preds.shape == (BATCH,)
    assert bool(jnp.all(preds >= 0.0)) and bool(jnp.all(preds <= 5.0))
    assert bool(jnp.all(jnp.isfinite(preds)))

    print("KERNEL_OK")
</pallas_src>

<mosaic_0001>
module attributes {stable_mosaic.version = 11 : i64} {
  func.func @_recommender_kernel(%arg0: i32, %arg1: memref<8x128xbf16, #tpu.memory_space<vmem>>, %arg2: memref<8x4xbf16, #tpu.memory_space<vmem>>, %arg3: memref<8x20xbf16, #tpu.memory_space<vmem>>, %arg4: memref<4x32xbf16, #tpu.memory_space<vmem>>, %arg5: memref<20x32xbf16, #tpu.memory_space<vmem>>, %arg6: memref<192x128xbf16, #tpu.memory_space<vmem>>, %arg7: memref<128x64xbf16, #tpu.memory_space<vmem>>, %arg8: memref<6x128xf32, #tpu.memory_space<vmem>>, %arg9: memref<1x8xf32, #tpu.memory_space<vmem>>) attributes {dimension_semantics = [#tpu.dimension_semantics<parallel>], iteration_bounds = array<i64: 1>, scalar_prefetch = 0 : i64, scratch_operands = 0 : i64, tpu.core_type = #tpu.core_type<tc>, window_params = [{transform_indices = @transform_0, window_bounds = array<i64: 8, 128>}, {transform_indices = @transform_1, window_bounds = array<i64: 8, 4>}, {transform_indices = @transform_2, window_bounds = array<i64: 8, 20>}, {pipeline_mode = #tpu.pipeline_mode<synchronous>, transform_indices = @transform_3, window_bounds = array<i64: 4, 32>}, {pipeline_mode = #tpu.pipeline_mode<synchronous>, transform_indices = @transform_4, window_bounds = array<i64: 20, 32>}, {pipeline_mode = #tpu.pipeline_mode<synchronous>, transform_indices = @transform_5, window_bounds = array<i64: 192, 128>}, {pipeline_mode = #tpu.pipeline_mode<synchronous>, transform_indices = @transform_6, window_bounds = array<i64: 128, 64>}, {pipeline_mode = #tpu.pipeline_mode<synchronous>, transform_indices = @transform_7, window_bounds = array<i64: 6, 128>}, {transform_indices = @transform_8, window_bounds = array<i64: 1, 8>}]} {
    %c0 = arith.constant 0 : index
    %c0_0 = arith.constant 0 : index
    %0 = vector.load %arg8[%c0, %c0_0] : memref<6x128xf32, #tpu.memory_space<vmem>>, vector<1x32xf32>
    %c1 = arith.constant 1 : index
    %c0_1 = arith.constant 0 : index
    %1 = vector.load %arg8[%c1, %c0_1] : memref<6x128xf32, #tpu.memory_space<vmem>>, vector<1x32xf32>
    %c2 = arith.constant 2 : index
    %c0_2 = arith.constant 0 : index
    %2 = vector.load %arg8[%c2, %c0_2] : memref<6x128xf32, #tpu.memory_space<vmem>>, vector<1x128xf32>
    %c3 = arith.constant 3 : index
    %c0_3 = arith.constant 0 : index
    %3 = vector.load %arg8[%c3, %c0_3] : memref<6x128xf32, #tpu.memory_space<vmem>>, vector<1x64xf32>
    %c4 = arith.constant 4 : index
    %c0_4 = arith.constant 0 : index
    %4 = vector.load %arg8[%c4, %c0_4] : memref<6x128xf32, #tpu.memory_space<vmem>>, vector<1x64xf32>
    %c5 = arith.constant 5 : index
    %c0_5 = arith.constant 0 : index
    %5 = vector.load %arg8[%c5, %c0_5] : memref<6x128xf32, #tpu.memory_space<vmem>>, vector<1x1xf32>
    %c0_6 = arith.constant 0 : index
    %c0_7 = arith.constant 0 : index
    %6 = vector.load %arg2[%c0_6, %c0_7] : memref<8x4xbf16, #tpu.memory_space<vmem>>, vector<8x4xbf16>
    %c0_8 = arith.constant 0 : index
    %c0_9 = arith.constant 0 : index
    %7 = vector.load %arg4[%c0_8, %c0_9] : memref<4x32xbf16, #tpu.memory_space<vmem>>, vector<4x32xbf16>
    %cst = arith.constant dense<0.000000e+00> : vector<8x32xf32>
    %8 = tpu.matmul %6, %7, %cst {dimension_numbers = #tpu.dot_dimension_numbers<[1], [0], [0], [1], [0, 0, 1, 1], [], []>} : vector<8x4xbf16>, vector<4x32xbf16>, vector<8x32xf32> -> vector<8x32xf32>
    %9 = vector.broadcast %0 : vector<1x32xf32> to vector<8x32xf32>
    %10 = arith.addf %8, %9 : vector<8x32xf32>
    %cst_10 = arith.constant 0.000000e+00 : f32
    %11 = vector.broadcast %cst_10 : f32 to vector<8x32xf32>
    %12 = arith.maximumf %10, %11 : vector<8x32xf32>
    %c0_11 = arith.constant 0 : index
    %c0_12 = arith.constant 0 : index
    %13 = vector.load %arg3[%c0_11, %c0_12] : memref<8x20xbf16, #tpu.memory_space<vmem>>, vector<8x20xbf16>
    %c0_13 = arith.constant 0 : index
    %c0_14 = arith.constant 0 : index
    %14 = vector.load %arg5[%c0_13, %c0_14] : memref<20x32xbf16, #tpu.memory_space<vmem>>, vector<20x32xbf16>
    %cst_15 = arith.constant dense<0.000000e+00> : vector<8x32xf32>
    %15 = tpu.matmul %13, %14, %cst_15 {dimension_numbers = #tpu.dot_dimension_numbers<[1], [0], [0], [1], [0, 0, 1, 1], [], []>} : vector<8x20xbf16>, vector<20x32xbf16>, vector<8x32xf32> -> vector<8x32xf32>
    %16 = vector.broadcast %1 : vector<1x32xf32> to vector<8x32xf32>
    %17 = arith.addf %15, %16 : vector<8x32xf32>
    %cst_16 = arith.constant 0.000000e+00 : f32
    %18 = vector.broadcast %cst_16 : f32 to vector<8x32xf32>
    %19 = arith.maximumf %17, %18 : vector<8x32xf32>
    %c0_17 = arith.constant 0 : index
    %c0_18 = arith.constant 0 : index
    %20 = vector.load %arg1[%c0_17, %c0_18] : memref<8x128xbf16, #tpu.memory_space<vmem>>, vector<8x128xbf16>
    %c0_19 = arith.constant 0 : index
    %c0_20 = arith.constant 0 : index
    %21 = vector.load %arg6[%c0_19, %c0_20] : memref<192x128xbf16, #tpu.memory_space<vmem>>, vector<128x128xbf16>
    %cst_21 = arith.constant dense<0.000000e+00> : vector<8x128xf32>
    %22 = tpu.matmul %20, %21, %cst_21 {dimension_numbers = #tpu.dot_dimension_numbers<[1], [0], [0], [1], [0, 0, 1, 1], [], []>} : vector<8x128xbf16>, vector<128x128xbf16>, vector<8x128xf32> -> vector<8x128xf32>
    %23 = arith.truncf %12 : vector<8x32xf32> to vector<8x32xbf16>
    %c128 = arith.constant 128 : index
    %c0_22 = arith.constant 0 : index
    %24 = vector.load %arg6[%c128, %c0_22] : memref<192x128xbf16, #tpu.memory_space<vmem>>, vector<32x128xbf16>
    %cst_23 = arith.constant dense<0.000000e+00> : vector<8x128xf32>
    %25 = tpu.matmul %23, %24, %cst_23 {dimension_numbers = #tpu.dot_dimension_numbers<[1], [0], [0], [1], [0, 0, 1, 1], [], []>} : vector<8x32xbf16>, vector<32x128xbf16>, vector<8x128xf32> -> vector<8x128xf32>
    %26 = arith.addf %22, %25 : vector<8x128xf32>
    %27 = arith.truncf %19 : vector<8x32xf32> to vector<8x32xbf16>
    %c160 = arith.constant 160 : index
    %c0_24 = arith.constant 0 : index
    %28 = vector.load %arg6[%c160, %c0_24] : memref<192x128xbf16, #tpu.memory_space<vmem>>, vector<32x128xbf16>
    %cst_25 = arith.constant dense<0.000000e+00> : vector<8x128xf32>
    %29 = tpu.matmul %27, %28, %cst_25 {dimension_numbers = #tpu.dot_dimension_numbers<[1], [0], [0], [1], [0, 0, 1, 1], [], []>} : vector<8x32xbf16>, vector<32x128xbf16>, vector<8x128xf32> -> vector<8x128xf32>
    %30 = arith.addf %26, %29 : vector<8x128xf32>
    %31 = vector.broadcast %2 : vector<1x128xf32> to vector<8x128xf32>
    %32 = arith.addf %30, %31 : vector<8x128xf32>
    %cst_26 = arith.constant 0.000000e+00 : f32
    %33 = vector.broadcast %cst_26 : f32 to vector<8x128xf32>
    %34 = arith.maximumf %32, %33 : vector<8x128xf32>
    %35 = arith.truncf %34 : vector<8x128xf32> to vector<8x128xbf16>
    %c0_27 = arith.constant 0 : index
    %c0_28 = arith.constant 0 : index
    %36 = vector.load %arg7[%c0_27, %c0_28] : memref<128x64xbf16, #tpu.memory_space<vmem>>, vector<128x64xbf16>
    %cst_29 = arith.constant dense<0.000000e+00> : vector<8x64xf32>
    %37 = tpu.matmul %35, %36, %cst_29 {dimension_numbers = #tpu.dot_dimension_numbers<[1], [0], [0], [1], [0, 0, 1, 1], [], []>} : vector<8x128xbf16>, vector<128x64xbf16>, vector<8x64xf32> -> vector<8x64xf32>
    %38 = vector.broadcast %3 : vector<1x64xf32> to vector<8x64xf32>
    %39 = arith.addf %37, %38 : vector<8x64xf32>
    %cst_30 = arith.constant 0.000000e+00 : f32
    %40 = vector.broadcast %cst_30 : f32 to vector<8x64xf32>
    %41 = arith.maximumf %39, %40 : vector<8x64xf32>
    %cst_31 = arith.constant dense<0.000000e+00> : vector<1x8xf32>
    %42 = tpu.matmul %4, %41, %cst_31 {dimension_numbers = #tpu.dot_dimension_numbers<[1], [1], [0], [0], [0, 0, 1, 0], [], []>} : vector<1x64xf32>, vector<8x64xf32>, vector<1x8xf32> -> vector<1x8xf32>
    %43 = vector.broadcast %5 : vector<1x1xf32> to vector<1x8xf32>
    %44 = arith.addf %42, %43 : vector<1x8xf32>
    %45 = arith.negf %44 : vector<1x8xf32>
    %46 = math.exp %45 : vector<1x8xf32>
    %cst_32 = arith.constant 1.000000e+00 : f32
    %47 = vector.broadcast %cst_32 : f32 to vector<1x8xf32>
    %48 = arith.addf %47, %46 : vector<1x8xf32>
    %49 = arith.divf %47, %48 : vector<1x8xf32>
    %cst_33 = arith.constant 5.000000e+00 : f32
    %50 = vector.broadcast %cst_33 : f32 to vector<1x8xf32>
    %51 = arith.mulf %49, %50 : vector<1x8xf32>
    %c0_34 = arith.constant 0 : index
    %c0_35 = arith.constant 0 : index
    %52 = vector.load %arg9[%c0_34, %c0_35] : memref<1x8xf32, #tpu.memory_space<vmem>>, vector<1x8xf32>
    tpu.vector_store %arg9[%c0_34, %c0_35], %51 {strides = array<i32>} : memref<1x8xf32, #tpu.memory_space<vmem>>, vector<1x8xf32>,
    return
  }
  func.func @transform_0(%arg0: i32) -> (i32, i32) {
    %c0_i32 = arith.constant 0 : i32
    %c0_i32_0 = arith.constant 0 : i32
    return %arg0, %c0_i32 : i32, i32
  }
  func.func @transform_1(%arg0: i32) -> (i32, i32) {
    %c0_i32 = arith.constant 0 : i32
    %c0_i32_0 = arith.constant 0 : i32
    return %arg0, %c0_i32 : i32, i32
  }
  func.func @transform_2(%arg0: i32) -> (i32, i32) {
    %c0_i32 = arith.constant 0 : i32
    %c0_i32_0 = arith.constant 0 : i32
    return %arg0, %c0_i32 : i32, i32
  }
  func.func @transform_3(%arg0: i32) -> (i32, i32) {
    %c0_i32 = arith.constant 0 : i32
    %c0_i32_0 = arith.constant 0 : i32
    %c0_i32_1 = arith.constant 0 : i32
    return %c0_i32, %c0_i32_0 : i32, i32
  }
  func.func @transform_4(%arg0: i32) -> (i32, i32) {
    %c0_i32 = arith.constant 0 : i32
    %c0_i32_0 = arith.constant 0 : i32
    %c0_i32_1 = arith.constant 0 : i32
    return %c0_i32, %c0_i32_0 : i32, i32
  }
  func.func @transform_5(%arg0: i32) -> (i32, i32) {
    %c0_i32 = arith.constant 0 : i32
    %c0_i32_0 = arith.constant 0 : i32
    %c0_i32_1 = arith.constant 0 : i32
    return %c0_i32, %c0_i32_0 : i32, i32
  }
  func.func @transform_6(%arg0: i32) -> (i32, i32) {
    %c0_i32 = arith.constant 0 : i32
    %c0_i32_0 = arith.constant 0 : i32
    %c0_i32_1 = arith.constant 0 : i32
    return %c0_i32, %c0_i32_0 : i32, i32
  }
  func.func @transform_7(%arg0: i32) -> (i32, i32) {
    %c0_i32 = arith.constant 0 : i32
    %c0_i32_0 = arith.constant 0 : i32
    %c0_i32_1 = arith.constant 0 : i32
    return %c0_i32, %c0_i32_0 : i32, i32
  }
  func.func @transform_8(%arg0: i32) -> (i32, i32) {
    %c0_i32 = arith.constant 0 : i32
    %c0_i32_0 = arith.constant 0 : i32
    return %arg0, %c0_i32 : i32, i32
  }
}

</mosaic_0001>

<bundles_post_ra>
// kernel: tv_recommender_forward.1
= control target key start
LH: loop header
LB: loop body
LE: loop exit
PB: predicated region body
PF: predicated region fallthrough
CT: control target
= control target key end

     0   :  { %vm47_vm0 = vcmask 1041408   ;;  %v799_v1 = vmov 0.0   ;;  %vm43_vm1 = vcmask 31744   ;;  %vm800_vm2 = vmmov 0   ;;  %s998_s0 = inlined_call_operand.vmem [shape: bf16[8,128], index: 0, kind: input, shape index: {}]   ;;  %s999_s1 = inlined_call_operand.vmem [shape: bf16[8,4], index: 1, kind: input, shape index: {}]   ;;  %s1000_s2 = inlined_call_operand.vmem [shape: bf16[8,20], index: 2, kind: input, shape index: {}]   ;;  %s1001_s3 = inlined_call_operand.vmem [shape: bf16[4,32], index: 3, kind: input, shape index: {}]   ;;  %s1002_s4 = inlined_call_operand.vmem [shape: bf16[20,32], index: 4, kind: input, shape index: {}]   ;;  %s1003_s5 = inlined_call_operand.vmem [shape: bf16[192,128], index: 5, kind: input, shape index: {}]   ;;  %s1004_s6 = inlined_call_operand.vmem [shape: bf16[128,64], index: 6, kind: input, shape index: {}]   ;;  %s1005_s7 = inlined_call_operand.vmem [shape: f32[6,128], index: 7, kind: input, shape index: {}]   ;;  %s1006_s8 = inlined_call_operand.hbm [shape: f32[1,8], index: 8, kind: output, shape index: {}]  }
   0x1   :  { %v38_v0 = vld [vmem:[%s1001_s3] sm:$0x3]  ;;  %669 = vmatprep.subr.bf16.mxu1 %v799_v1  ;;  %683 = vmatprep.subr.bf16.mxu0 %v799_v1  ;;  %v749_v4 = vld [vmem:[%s1002_s4 + $0x8] ss:$0 sps:$4 sm:$0x33]   ;;  %vm109_vm3 = vcmask 162816  }
   0x2   :  { %v49_v2 = vsel %vm47_vm0, %v38_v0, 0  ;;  %671 = vmatprep.mubr.msk.bf16.mxu1 %vm800_vm2, %v799_v1  ;;  %v37_v3 = vld [vmem:[%s999_s1] sm:$0xf]  ;;  %687 = vmatprep.mubr.msk.bf16.mxu0 %vm800_vm2, %v799_v1  ;;  %v114_v6 = vsel %vm47_vm0, %v749_v4, 0  ;;  %v752_v9 = vld [vmem:[%s1003_s5 + $0x8] sm:$0xff]   ;;  %v753_v10 = vld [vmem:[%s1003_s5 + $0x10] sm:$0xff]  }
   0x3   :  { %670 = vmatpush3.bf16.msra.mxu1 %v49_v2  ;;  %v750_v5 = vld [vmem:[%s1002_s4] sm:$0xff]  }
   0x4   :  { %675 = vmatprep.subr.bf16.mxu1 %v799_v1  ;;  %v92_v7 = vld [vmem:[%s1000_s2] sm:$0xf] }
   0x5   :  { %v751_v8 = vld [vmem:[%s1003_s5] sm:$0xff]  }
   0x6   :  { %672 = vmatmul.mubr.msk.bf16.vlgmr.msra.gmra.mrb[0].mxu1 %vm43_vm1, %v37_v3 }
   0x7   :  { %676 = vmatpush3.bf16.msra.mxu1 %v750_v5  ;;  %679 = vmatprep.mubr.msk.bf16.mxu1 %vm800_vm2, %v799_v1 }
   0x8   :  { %677 = vmatprep.subr.bf16.mxu1 %v799_v1 }
   0xb   :  { %678 = vmatpush3.bf16.msra.mxu1 %v114_v6 }
   0xc   :  { %691 = vmatprep.subr.bf16.mxu1 %v799_v1 }
   0xe   :  { %680 = vmatmul.mubr.msk.bf16.vlgmr.msra.gmra.mrb[4].mxu1 %vm109_vm3, %v92_v7 }
   0xf   :  { %692 = vmatpush3.bf16.msra.mxu1 %v751_v8  ;;  %707 = vmatprep.mubr.msk.bf16.mxu1 %vm800_vm2, %v799_v1 }
  0x10   :  { %693 = vmatprep.subr.bf16.mxu1 %v799_v1 }
  0x13   :  { %694 = vmatpush3.bf16.msra.mxu1 %v752_v9 }
  0x14   :  { %695 = vmatprep.subr.bf16.mxu1 %v799_v1 }
  0x15   :  { %13 = vsyncpa [#allocation3], 0  ;;  %v754_v11 = vld [vmem:[%s1003_s5 + $0x18] sm:$0xff]   ;;  %v755_v12 = vld [vmem:[%s1003_s5 + $0x20] sm:$0xff]   ;;  %vm191_vm4 = vcmask 261120   ;;  %v801_v0 = vmov 0  }
  0x16   :  { %v756_v13 = vld [vmem:[%s1003_s5 + $0x28] sm:$0xff]   ;;  %v757_v14 = vld [vmem:[%s1003_s5 + $0x40] sm:$0xff]   ;;  %v758_v15 = vld [vmem:[%s1003_s5 + $0x30] sm:$0xff]   ;;  %748 = vset.pattern.permute.xlu0 %v801_v0  ;;  %vm505_vm5 = vcmask 523264   ;;  %s802_s12 = smov [#allocation2]   ;;  %vm589_vm6 = vcmask 57344  }
  0x17   :  { %696 = vmatpush3.bf16.msra.mxu1 %v753_v10  ;;  %684 = vmatpush3.bf16.msra.mxu0 %v757_v14  ;;  %v759_v16 = vld [vmem:[%s1003_s5 + $0x48] sm:$0xff]   ;;  %v760_v17 = vld [vmem:[%s1003_s5 + $0x38] sm:$0xff]   ;;  %v157_v18 = vld [vmem:[%s998_s0] sm:$0xf]  ;;  %s597_s0 = sshll.u32 %s802_s12, 4  ;;  %s598_s0 = int_to_ptr.vmem [resolvable:$true] %s597_s0 }
  0x18   :  { %697 = vmatprep.subr.bf16.mxu1 %v799_v1  ;;  %685 = vmatprep.subr.bf16.mxu0 %v799_v1  ;;  %v605_v19 = vld [vmem:[%s1005_s7] ss:$0 sm:$0xff]  ;;  %v761_v26 = vld [vmem:[%s1003_s5 + $0x50] sm:$0xff]   ;;  %v607_v28 = vld [vmem:[%s1005_s7 + $0x1] ss:$0 sm:$0xff]  ;;  %s775_s13 = scalar_lea.vmem %s598_s0, 16  ;;  %p780_p1 = scmp.lt.s32.totalorder %s598_s0, %s598_s0 }
  0x19   :  { %v762_v30 = vld [vmem:[%s1003_s5 + $0x58] sm:$0xff]   ;;  %v763_v36 = vld [vmem:[%s1004_s6] sm:$0xff]   ;;  %v764_v38 = vld [vmem:[%s1004_s6 + $0x8] sm:$0xff]   ;;  %p776_p0 = scmp.ne.s32.totalorder %s598_s0, %s775_s13 }
  0x1a   :  { %v765_v39 = vld [vmem:[%s1004_s6 + $0x10] sm:$0xff]   ;;  %v766_v40 = vld [vmem:[%s1004_s6 + $0x18] sm:$0xff]   ;;  %v767_v42 = vld [vmem:[%s1004_s6 + $0x20] sm:$0xff]  }
  0x1b   :  { %698 = vmatpush3.bf16.msra.mxu1 %v754_v11  ;;  %686 = vmatpush3.bf16.msra.mxu0 %v759_v16  ;;  %v768_v46 = vld [vmem:[%s1004_s6 + $0x28] sm:$0xff]   ;;  %v769_v47 = vld [vmem:[%s1004_s6 + $0x30] sm:$0xff]   ;;  %v770_v48 = vld [vmem:[%s1004_s6 + $0x38] sm:$0xff]  }
  0x1c   :  { %699 = vmatprep.subr.bf16.mxu1 %v799_v1  ;;  %711 = vmatprep.subr.bf16.mxu0 %v799_v1  ;;  %v625_v54 = vld [vmem:[%s1005_s7 + $0x2] ss:$0 sm:$0xff]  ;;  %v36_v63 = vld [vmem:[%s1005_s7 + $0x5] sm:$0x1]  ;;  %v35_v8 = vld [vmem:[%s1005_s7 + $0x4] sm:$0x1] }
  0x1d   :  { %502 = vperm.xlu0 %748, %v36_v63  }
  0x1f   :  { %700 = vmatpush3.bf16.msra.mxu1 %v755_v12 }
  0x20   :  { %701 = vmatprep.subr.bf16.mxu1 %v799_v1 }
  0x23   :  { %702 = vmatpush3.bf16.msra.mxu1 %v756_v13 }
  0x24   :  { %703 = vmatprep.subr.bf16.mxu1 %v799_v1 }
  0x27   :  { %704 = vmatpush3.bf16.msra.mxu1 %v758_v15 }
  0x28   :  { %705 = vmatprep.subr.bf16.mxu1 %v799_v1 }
  0x2b   :  { %706 = vmatpush3.bf16.msra.mxu1 %v760_v17 }
  0x2c   :  { %739 = vmatprep.subr.mxu1 %v799_v1 }
  0x2e   :  { %708 = vmatmul.mubr.bf16.vlgmr.msra.gmra.mrb[8].mxu1 %v157_v18 }
  0x2f   :  { %741 = vmatprep.mubr.msk.f32.mxu1 %vm800_vm2, %v799_v1 }
  0x9c   :  { %v503_v9 = vpop.permute.xlu0 %502 }
  0xd9   :  { %v85_v20 = vpop.f32.mrb[0].mxu1 }
  0xda   :  { %v86_v21 = vadd.f32 %v605_v19, %v85_v20  ;;  %v673_v22 = vpop.f32.mrb[1].mxu1 }
  0xdb   :  { %v88_v23 = vpop.f32.mrb[2].mxu1 }
  0xdc   :  { %v91_v24 = vmax.f32 %v86_v21, 0.0  ;;  %v674_v25 = vpop.f32.mrb[3].mxu1 }
  0xde   :  { %v174_v27 = vpack.c.bf16 %v91_v24, %v91_v24 }
  0xe0   :  { %688 = vmatmul.mubr.msk.bf16.vlgmr.msra.gmra.mrb[0].mxu0 %vm191_vm4, %v174_v27 }
  0xe1   :  { %v150_v29 = vpop.f32.mrb[4].mxu1  ;;  %712 = vmatpush3.bf16.msra.mxu0 %v761_v26  ;;  %715 = vmatprep.mubr.msk.bf16.mxu0 %vm800_vm2, %v799_v1 }
  0xe2   :  { %v151_v31 = vadd.f32 %v607_v28, %v150_v29  ;;  %v681_v32 = vpop.f32.mrb[5].mxu1  ;;  %713 = vmatprep.subr.bf16.mxu0 %v799_v1 }
  0xe3   :  { %v153_v33 = vpop.f32.mrb[6].mxu1 }
  0xe4   :  { %v156_v34 = vmax.f32 %v151_v31, 0.0  ;;  %v682_v35 = vpop.f32.mrb[7].mxu1 }
  0xe5   :  { %714 = vmatpush3.bf16.msra.mxu0 %v762_v30 }
  0xe6   :  { %v323_v37 = vpack.c.bf16 %v156_v34, %v156_v34  ;;  %719 = vmatprep.subr.bf16.mxu0 %v799_v1 }
  0xe8   :  { %716 = vmatmul.mubr.msk.bf16.vlgmr.msra.gmra.mrb[4].mxu0 %vm191_vm4, %v323_v37 }
  0xe9   :  { %720 = vmatpush3.bf16.msra.mxu0 %v763_v36  ;;  %735 = vmatprep.mubr.msk.bf16.mxu0 %vm800_vm2, %v799_v1 }
  0xea   :  { %721 = vmatprep.subr.bf16.mxu0 %v799_v1 }
  0xed   :  { %722 = vmatpush3.bf16.msra.mxu0 %v764_v38 }
  0xee   :  { %723 = vmatprep.subr.bf16.mxu0 %v799_v1 }
  0xf1   :  { %724 = vmatpush3.bf16.msra.mxu0 %v765_v39 }
  0xf2   :  { %725 = vmatprep.subr.bf16.mxu0 %v799_v1 }
  0xf5   :  { %726 = vmatpush3.bf16.msra.mxu0 %v766_v40 }
  0xf6   :  { %727 = vmatprep.subr.bf16.mxu0 %v799_v1 }
  0xf9   :  { %728 = vmatpush3.bf16.msra.mxu0 %v767_v42 }
  0xfa   :  { %729 = vmatprep.subr.bf16.mxu0 %v799_v1 }
  0xfd   :  { %730 = vmatpush3.bf16.msra.mxu0 %v768_v46 }
  0xfe   :  { %731 = vmatprep.subr.bf16.mxu0 %v799_v1 }
 0x101   :  { %v317_v41 = vpop.f32.mrb[8].mxu1  ;;  %732 = vmatpush3.bf16.msra.mxu0 %v769_v47 }
 0x102   :  { %v709_v43 = vpop.f32.mrb[9].mxu1  ;;  %733 = vmatprep.subr.bf16.mxu0 %v799_v1  ;;  %v626_v1 = vld [vmem:[%s1005_s7 + $0x3] ss:$0 sm:$0xff]  ;;  %s779_s7 = scalar_lea.vmem %s598_s0, 32 }
 0x103   :  { %v320_v44 = vpop.f32.mrb[10].mxu1  ;;  %p781_p2 = scmp.lt.s32.totalorder %s779_s7, %s775_s13 }
 0x104   :  { %v710_v45 = vpop.f32.mrb[11].mxu1 }
 0x105   :  { %734 = vmatpush3.bf16.msra.mxu0 %v770_v48  ;;  %p782_p3 = por %p781_p2, %p780_p1 }
 0x107   :  { %p783_p4 = pnand %p782_p3, %p776_p0 }
 0x1b3   :  { %v229_v49 = vpop.f32.mrb[0].mxu0 }
 0x1b4   :  { %v318_v50 = vadd.f32 %v317_v41, %v229_v49  ;;  %v689_v51 = vpop.f32.mrb[1].mxu0 }
 0x1b5   :  { %v232_v52 = vpop.f32.mrb[2].mxu0 }
 0x1b6   :  { %v690_v53 = vpop.f32.mrb[3].mxu0 }
 0x1bb   :  { %v377_v55 = vpop.f32.mrb[4].mxu0 }
 0x1bc   :  { %v383_v56 = vadd.f32 %v377_v55, %v318_v50  ;;  %v717_v57 = vpop.f32.mrb[5].mxu0 }
 0x1bd   :  { %v380_v58 = vpop.f32.mrb[6].mxu0 }
 0x1be   :  { %v388_v59 = vadd.f32 %v625_v54, %v383_v56  ;;  %v718_v60 = vpop.f32.mrb[7].mxu0 }
 0x1c0   :  { %v389_v61 = vmax.f32 %v388_v59, 0.0 }
 0x1c2   :  { %v390_v62 = vpack.c.bf16 %v389_v61, %v389_v61 }
 0x1c4   :  { %736 = vmatmul.mubr.bf16.vlgmr.msra.gmra.mrb[8].mxu0 %v390_v62 }
 0x297   :  { %v493_v2 = vpop.f32.mrb[8].mxu0 }
 0x298   :  { %v494_v3 = vadd.f32 %v626_v1, %v493_v2  ;;  %v737_v4 = vpop.f32.mrb[9].mxu0 }
 0x299   :  { %v496_v5 = vpop.f32.mrb[10].mxu0 }
 0x29a   :  { %v499_v6 = vmax.f32 %v494_v3, 0.0  ;;  %v738_v7 = vpop.f32.mrb[11].mxu0 }
 0x29c   :  { %740 = vmatpush3.xpose.msk.msra.mxu1 %vm505_vm5, %v499_v6 }
 0x29f   :  { %742 = vmatmul.mubr.msk.f32.vlgmr.msra.gmra.mrb[12].mxu1 %vm505_vm5, %v35_v8 }
 0x372   :  { %v578_v10 = vpop.f32.mrb[12].mxu1 }
 0x373   :  { %v579_v11 = vadd.f32 %v578_v10, %v503_v9  ;;  %v743_v12 = vpop.f32.mrb[13].mxu1 }
 0x375   :  { %v637_v13 = vmul.f32 -1.442695, %v579_v11 }
 0x377   :  { %771 = vpow2.f32 %v637_v13 }
 0x381   :  { %v772_v14 = vpop.eup %771 }
 0x382   :  { %v585_v15 = vadd.f32 1.0, %v772_v14 }
 0x384   :  { %773 = vrcp.f32 %v585_v15 }
 0x38e   :  { %v774_v16 = vpop.eup %773 }
 0x38f   :  { %v588_v17 = vmul.f32 5.0, %v774_v16 }
 0x391   :  { %590 = vst.msk [vmem:[#allocation2] sm:$0x1] %vm589_vm6, %v588_v17 }
 0x392   :  { %786 = shalt.err (!%p783_p4)
}
 0x393   :  { %s787_s15 = scalar_lea.hbm %s1006_s8, 16 }
 0x394   :  { %p788_p5 = scmp.ne.s32.totalorder %s1006_s8, %s787_s15  ;;  %p791_p6 = scmp.lt.u32.totalorder %s787_s15, %s1006_s8 }
 0x396   :  { %p793_p7 = pnand %p791_p6, %p788_p5 }
 0x398   :  { %796 = shalt.err (!%p793_p7)
}
 0x399   :  { %600 = dma.vmem_to_hbm [thread:$0]  %s598_s0, 16, %s1006_s8, [#allocation3]  }
 0x39a   :  { %797 = dma.done.wait [#allocation3], 16  }
 0x39b   :  { %798 = vsyncadd [#allocation3], 4294967280 }
 0x39c   :  { %604 = vsyncpa [#allocation3], 1 }

</bundles_post_ra>
